<compile_context>
chip_gen: v7x
topology: tpu7x:2x2x1
jax: 0.10.0
libtpu: 0.0.40
codegen_flags: <defaults>
</compile_context>

<pallas_src>
import functools

import jax
import jax.numpy as jnp
from jax import lax
from jax.experimental import pallas as pl
from jax.experimental.pallas import tpu as pltpu


def _round_up(x: int, m: int) -> int:
    return (x + m - 1) // m * m


def _cdiv(a: int, b: int) -> int:
    return (a + b - 1) // b


@functools.lru_cache(maxsize=1)
def _chip_info():
    """(physical VMEM bytes, TensorCores per chip), with safe fallbacks."""
    vmem_phys = 64 << 20   # v7x-sized fallback: a plan that fits here fits everywhere
    n_cores = 1
    try:
        info = pltpu.get_tpu_info()
        vmem_phys = int(getattr(info, "vmem_capacity_bytes", vmem_phys))
        for attr in ("num_cores", "tensorcores_per_chip", "num_tensor_cores"):
            v = getattr(info, attr, None)
            if v:
                n_cores = int(v)
                break
    except Exception:
        pass
    return vmem_phys, n_cores


def _pick_tiles(M, N, K, in_itemsize, out_itemsize, vmem_budget):
    """Pick (tm, tn, tk, sublane_mult) under a double-buffered VMEM budget."""
    sub = max(8, 32 // in_itemsize)            # 8 for f32, 16 for bf16, 32 for int8
    TM_CAP, TN_CAP, TK_CAP = 512, 512, 2048

    # Prefer tile == full dim (no padding, "full dim" layout exception).
    tm = M if M <= TM_CAP else TM_CAP
    tn = N if N <= TN_CAP else TN_CAP
    tk = K if K <= TK_CAP else TK_CAP
    # When actually tiling a dim, the tile must honor (sublane, lane) granularity.
    if tm != M:
        tm = max(sub, tm // sub * sub)
    if tn != N:
        tn = max(128, tn // 128 * 128)
    if tk != K:
        tk = max(128, tk // 128 * 128)

    def fits(tm_, tn_, tk_):
        fp = (2 * (tm_ * tk_ + tn_ * tk_) * in_itemsize   # x, W double-buffered
              + 2 * tm_ * tn_ * out_itemsize               # out double-buffered
              + tm_ * tn_ * 4                              # f32 accumulator
              + 2 * tn_ * 4)                               # bias
        return fp <= vmem_budget

    while not fits(tm, tn, tk):
        if tk > 512:
            tk = max(512, _round_up(tk // 2, 128))
        elif tn > 128:
            tn = max(128, _round_up(tn // 2, 128))
        elif tm > sub:
            tm = max(sub, _round_up(tm // 2, sub))
        elif tk > 128:
            tk = max(128, _round_up(tk // 2, 128))
        else:
            break
    return tm, tn, tk, sub


def _linear_kernel(x_ref, w_ref, b_ref, o_ref, acc_ref, *, mxu_dtype):
    """One (tm, tn) output tile; K is the last (reduction) grid axis.

    x_ref : (tm, tk)       activations
    w_ref : (tn, tk)       weight in its native (out, in) layout -> trans_b dot
    b_ref : (1, tn) f32    bias
    o_ref : (tm, tn)       output tile
    acc_ref:(tm, tn) f32   accumulator, resident across the K grid axis
    """
    k = pl.program_id(2)

    @pl.when(k == 0)
    def _():
        # Initialize the accumulator with the broadcast bias: the epilogue is
        # then just cast + store (no extra VPU add at k == last).
        acc_ref[...] = jnp.broadcast_to(b_ref[...], acc_ref.shape)

    # bf16 MXU feed (default) with f32 accumulation; no-op cast when the input
    # dtype already equals mxu_dtype (e.g. precision="highest" on f32 inputs).
    x = x_ref[...].astype(mxu_dtype)
    w = w_ref[...].astype(mxu_dtype)
    acc_ref[...] += lax.dot_general(
        x, w,
        dimension_numbers=(((1,), (1,)), ((), ())),   # contract K of both (trans_b)
        preferred_element_type=jnp.float32,
    )

    @pl.when(k == pl.num_programs(2) - 1)
    def _():
        o_ref[...] = acc_ref[...].astype(o_ref.dtype)


@functools.partial(jax.jit, static_argnames=("use_pallas", "precision"))
def custom_linear(x, weight, bias, use_pallas=None, precision="default"):
    """y = x @ weight.T + bias  (PyTorch CustomLinear.forward).

    use_pallas: None -> auto (tiny problems go to XLA), True/False -> force.
    precision : "default" -> bf16 MXU feed + f32 accumulation (fast);
                "highest" -> feed the MXU in the input dtype (exact for f32).
    """
    *lead, in_features = x.shape
    out_features = weight.shape[0]
    assert weight.shape == (out_features, in_features)
    assert bias.shape == (out_features,)

    M = 1
    for d in lead:
        M *= d
    K, N = in_features, out_features

    if use_pallas is None:
        # Tiny problems: launch + DMA + MXU-padding overheads dominate; XLA wins.
        use_pallas = (K >= 128) and (N >= 128) and (2 * M * N * K >= 8_000_000)
    if not use_pallas:
        return x @ weight.T + bias

    out_dtype = x.dtype
    in_itemsize = jnp.dtype(x.dtype).itemsize
    out_itemsize = jnp.dtype(out_dtype).itemsize
    if precision == "highest" or in_itemsize < 4:
        mxu_dtype = x.dtype          # exact / already-narrow inputs: no recast
    else:
        mxu_dtype = jnp.bfloat16     # default: bf16 MXU feed, f32 accumulation

    vmem_phys, n_cores = _chip_info()
    vmem_limit = min(int(vmem_phys * 3 // 4), 100 << 20)
    budget = max(vmem_limit - (8 << 20), 8 << 20)

    tm, tn, tk, sub = _pick_tiles(M, N, K, in_itemsize, out_itemsize, budget)

    # v7x (2 TensorCores/chip): make sure the "parallel" axes have >= 2 blocks.
    if n_cores > 1 and _cdiv(M, tm) * _cdiv(N, tn) < 2:
        new_tm = _round_up(_cdiv(M, 2), sub)
        if new_tm < tm:
            tm = new_tm
        else:
            new_tn = _round_up(_cdiv(N, 2), 128)
            if new_tn < tn:
                tn = new_tn

    Mp, Np, Kp = _round_up(M, tm), _round_up(N, tn), _round_up(K, tk)

    x2d = x.reshape(M, K)
    w2d = weight                                   # native (N, K): NO transpose copy
    b2d = bias.astype(jnp.float32).reshape(1, N)

    # Pad only when the tiles don't already divide the problem (K zero-padding
    # keeps the reduction exact; M/N padding is sliced off below).
    if (Mp, Kp) != (M, K):
        x2d = jnp.pad(x2d, ((0, Mp - M), (0, Kp - K)))
    if (Np, Kp) != (N, K):
        w2d = jnp.pad(w2d, ((0, Np - N), (0, Kp - K)))
    if Np != N:
        b2d = jnp.pad(b2d, ((0, 0), (0, Np - N)))

    grid = (Mp // tm, Np // tn, Kp // tk)

    cost = pl.CostEstimate(
        flops=2 * M * N * K,
        transcendentals=0,
        bytes_accessed=(M * K + N * K) * in_itemsize + M * N * out_itemsize + N * 4,
    )

    kernel = functools.partial(_linear_kernel, mxu_dtype=mxu_dtype)

    y2d = pl.pallas_call(
        kernel,
        out_shape=jax.ShapeDtypeStruct((Mp, Np), out_dtype),
        grid_spec=pltpu.PrefetchScalarGridSpec(
            num_scalar_prefetch=0,
            grid=grid,
            in_specs=[
                pl.BlockSpec((tm, tk), lambda i, j, k: (i, k)),   # x tile
                pl.BlockSpec((tn, tk), lambda i, j, k: (j, k)),   # W tile (out, in)
                pl.BlockSpec((1, tn), lambda i, j, k: (0, j)),    # bias tile
            ],
            out_specs=pl.BlockSpec((tm, tn), lambda i, j, k: (i, j)),
            scratch_shapes=[pltpu.VMEM((tm, tn), jnp.float32)],
        ),
        compiler_params=pltpu.CompilerParams(
            dimension_semantics=("parallel", "parallel", "arbitrary"),
            vmem_limit_bytes=vmem_limit,
        ),
        cost_estimate=cost,
    )(x2d, w2d, b2d)

    if (Mp, Np) != (M, N):
        y2d = y2d[:M, :N]
    return y2d.reshape(*lead, out_features)


if __name__ == "__main__":
    key = jax.random.PRNGKey(0)
    kx, kw, kb, kx2, kw2, kb2 = jax.random.split(key, 6)

    # Small shapes consistent with the module: batch=2, seq=8, in=32, out=64.
    in_features, out_features = 32, 64
    x = jax.random.normal(kx, (2, 8, in_features), dtype=jnp.float32)
    weight = jax.random.normal(kw, (out_features, in_features), dtype=jnp.float32) * 0.1
    bias = jax.random.normal(kb, (out_features,), dtype=jnp.float32) * 0.1

    # Force the Pallas path (auto-dispatch would route this tiny shape to XLA),
    # with the exact f32 MXU feed so the reference check is tight.
    y = custom_linear(x, weight, bias, use_pallas=True, precision="highest")
    y = jax.block_until_ready(y)
    y_ref = x @ weight.T + bias
    assert y.shape == (2, 8, out_features)
    assert jnp.allclose(y, y_ref, atol=1e-5, rtol=1e-5), "small-shape mismatch"

    # Medium shape exercising the default tiled path (bf16 MXU feed, f32 acc).
    M2, K2, N2 = 256, 512, 384
    x2 = jax.random.normal(kx2, (M2, K2), dtype=jnp.float32)
    w2 = jax.random.normal(kw2, (N2, K2), dtype=jnp.float32) * (K2 ** -0.5)
    b2 = jax.random.normal(kb2, (N2,), dtype=jnp.float32) * 0.1
    y2 = custom_linear(x2, w2, b2, use_pallas=True)
    y2 = jax.block_until_ready(y2)
    y2_ref = x2 @ w2.T + b2
    assert jnp.allclose(y2, y2_ref, atol=5e-2, rtol=5e-2), "medium-shape mismatch"

    print("KERNEL_OK")
</pallas_src>

<mosaic_0001>
module attributes {stable_mosaic.version = 11 : i64} {
  func.func @_linear_kernel(%arg0: i32, %arg1: i32, %arg2: i32, %arg3: memref<16x32xf32, #tpu.memory_space<vmem>>, %arg4: memref<64x32xf32, #tpu.memory_space<vmem>>, %arg5: memref<1x64xf32, #tpu.memory_space<vmem>>, %arg6: memref<16x64xf32, #tpu.memory_space<vmem>>, %arg7: memref<16x64xf32, #tpu.memory_space<vmem>>) attributes {dimension_semantics = [#tpu.dimension_semantics<parallel>, #tpu.dimension_semantics<parallel>, #tpu.dimension_semantics<arbitrary>], iteration_bounds = array<i64: 1, 1, 1>, scalar_prefetch = 0 : i64, scratch_operands = 1 : i64, tpu.core_type = #tpu.core_type<tc>, window_params = [{transform_indices = @transform_0, window_bounds = array<i64: 16, 32>}, {transform_indices = @transform_1, window_bounds = array<i64: 64, 32>}, {transform_indices = @transform_2, window_bounds = array<i64: 1, 64>}, {transform_indices = @transform_3, window_bounds = array<i64: 16, 64>}]} {
    %c0_i32 = arith.constant 0 : i32
    %0 = arith.cmpi eq, %arg2, %c0_i32 : i32
    %1 = arith.extui %0 : i1 to i32
    %c0_i32_0 = arith.constant 0 : i32
    %2 = arith.cmpi ne, %1, %c0_i32_0 : i32
    scf.if %2 {
      %c0_10 = arith.constant 0 : index
      %c0_11 = arith.constant 0 : index
      %12 = vector.load %arg5[%c0_10, %c0_11] : memref<1x64xf32, #tpu.memory_space<vmem>>, vector<1x64xf32>
      %13 = vector.shape_cast %12 : vector<1x64xf32> to vector<1x64xf32>
      %14 = vector.broadcast %13 : vector<1x64xf32> to vector<16x64xf32>
      %c0_12 = arith.constant 0 : index
      %c0_13 = arith.constant 0 : index
      %15 = vector.load %arg7[%c0_12, %c0_13] : memref<16x64xf32, #tpu.memory_space<vmem>>, vector<16x64xf32>
      tpu.vector_store %arg7[%c0_12, %c0_13], %14 {strides = array<i32>} : memref<16x64xf32, #tpu.memory_space<vmem>>, vector<16x64xf32>,
    } else {
    }
    %c0 = arith.constant 0 : index
    %c0_1 = arith.constant 0 : index
    %3 = vector.load %arg3[%c0, %c0_1] : memref<16x32xf32, #tpu.memory_space<vmem>>, vector<16x32xf32>
    %c0_2 = arith.constant 0 : index
    %c0_3 = arith.constant 0 : index
    %4 = vector.load %arg4[%c0_2, %c0_3] : memref<64x32xf32, #tpu.memory_space<vmem>>, vector<64x32xf32>
    %c0_4 = arith.constant 0 : index
    %c0_5 = arith.constant 0 : index
    %5 = vector.load %arg7[%c0_4, %c0_5] : memref<16x64xf32, #tpu.memory_space<vmem>>, vector<16x64xf32>
    %cst = arith.constant dense<0.000000e+00> : vector<16x64xf32>
    %6 = tpu.matmul %3, %4, %cst {dimension_numbers = #tpu.dot_dimension_numbers<[1], [1], [0], [0], [0, 0, 1, 0], [], []>} : vector<16x32xf32>, vector<64x32xf32>, vector<16x64xf32> -> vector<16x64xf32>
    %7 = arith.addf %5, %6 : vector<16x64xf32>
    %c0_6 = arith.constant 0 : index
    %c0_7 = arith.constant 0 : index
    %8 = vector.load %arg7[%c0_6, %c0_7] : memref<16x64xf32, #tpu.memory_space<vmem>>, vector<16x64xf32>
    tpu.vector_store %arg7[%c0_6, %c0_7], %7 {strides = array<i32>} : memref<16x64xf32, #tpu.memory_space<vmem>>, vector<16x64xf32>,
    %c0_i32_8 = arith.constant 0 : i32
    %9 = arith.cmpi eq, %arg2, %c0_i32_8 : i32
    %10 = arith.extui %9 : i1 to i32
    %c0_i32_9 = arith.constant 0 : i32
    %11 = arith.cmpi ne, %10, %c0_i32_9 : i32
    scf.if %11 {
      %c0_10 = arith.constant 0 : index
      %c0_11 = arith.constant 0 : index
      %12 = vector.load %arg7[%c0_10, %c0_11] : memref<16x64xf32, #tpu.memory_space<vmem>>, vector<16x64xf32>
      %c0_12 = arith.constant 0 : index
      %c0_13 = arith.constant 0 : index
      %13 = vector.load %arg6[%c0_12, %c0_13] : memref<16x64xf32, #tpu.memory_space<vmem>>, vector<16x64xf32>
      tpu.vector_store %arg6[%c0_12, %c0_13], %12 {strides = array<i32>} : memref<16x64xf32, #tpu.memory_space<vmem>>, vector<16x64xf32>,
    } else {
    }
    return
  }
  func.func @transform_0(%arg0: i32, %arg1: i32, %arg2: i32) -> (i32, i32) {
    %c0_i32 = arith.constant 0 : i32
    return %arg0, %arg2 : i32, i32
  }
  func.func @transform_1(%arg0: i32, %arg1: i32, %arg2: i32) -> (i32, i32) {
    %c0_i32 = arith.constant 0 : i32
    return %arg1, %arg2 : i32, i32
  }
  func.func @transform_2(%arg0: i32, %arg1: i32, %arg2: i32) -> (i32, i32) {
    %c0_i32 = arith.constant 0 : i32
    %c0_i32_0 = arith.constant 0 : i32
    return %c0_i32, %arg1 : i32, i32
  }
  func.func @transform_3(%arg0: i32, %arg1: i32, %arg2: i32) -> (i32, i32) {
    %c0_i32 = arith.constant 0 : i32
    return %arg0, %arg1 : i32, i32
  }
}

</mosaic_0001>

<bundles_post_ra>
// kernel: custom_linear.1
= control target key start
LH: loop header
LB: loop body
LE: loop exit
PB: predicated region body
PF: predicated region fallthrough
CT: control target
= control target key end

     0   :  { %vm41_vm0 = vcmask 261120   ;;  %vm26_vm2 = vcmask 523264   ;;  %s364_s0 = inlined_call_operand.vmem [shape: f32[16,32], index: 0, kind: input, shape index: {}]   ;;  %s365_s1 = inlined_call_operand.vmem [shape: f32[64,32], index: 1, kind: input, shape index: {}]   ;;  %s366_s2 = inlined_call_operand.vmem [shape: f32[1,64], index: 2, kind: input, shape index: {}]   ;;  %s367_s3 = inlined_call_operand.hbm [shape: f32[16,64], index: 3, kind: output, shape index: {}]  }
   0x1   :  { %v31_v0 = vld [vmem:[%s365_s1] sm:$0xff]  ;;  %v32_v1 = vld [vmem:[%s365_s1 + $0x8] sm:$0xff]  ;;  %v33_v2 = vld [vmem:[%s365_s1 + $0x10] sm:$0xff] }
   0x2   :  { %v215_v3 = vpack.c.bf16 %v32_v1, %v31_v0  ;;  %vm300_vm1 = vmpackc.low %vm41_vm0, %vm41_vm0  ;;  %v34_v5 = vld [vmem:[%s365_s1 + $0x18] sm:$0xff]  ;;  %v29_v7 = vld [vmem:[%s364_s0] sm:$0xff] }
   0x3   :  { %v221_v6 = vpack.c.bf16 %v34_v5, %v33_v2  ;;  %v175_v8 = vld [vmem:[%s366_s2] ss:$0 sm:$0xff]  ;;  %212 = vmatprep.mubr.msk.f32.mxu0 %vm41_vm0, %v29_v7 }
   0x4   :  { %217 = vmatprep.subr.msk.bf16.mxu0 %vm300_vm1, %v215_v3  ;;  %28 = vst.msk [vmem:[#allocation2 + $0x8] sm:$0xff] %vm26_vm2, %v175_v8  ;;  %27 = vst.msk [vmem:[#allocation2] sm:$0xff] %vm26_vm2, %v175_v8 }
   0x5   :  { %220 = vmatpush3.bf16.xpose.msk.msra.mxu0 %vm300_vm1, %v215_v3 }
   0x6   :  { %8 = vsyncpa [#allocation4], 0  ;;  %223 = vmatprep.subr.msk.bf16.mxu0 %vm300_vm1, %v221_v6  ;;  %v35_v9 = vld [vmem:[%s365_s1 + $0x20] sm:$0xff]  ;;  %v36_v10 = vld [vmem:[%s365_s1 + $0x28] sm:$0xff] }
   0x7   :  { %v227_v11 = vpack.c.bf16 %v36_v10, %v35_v9  ;;  %v37_v12 = vld [vmem:[%s365_s1 + $0x30] sm:$0xff]  ;;  %v38_v13 = vld [vmem:[%s365_s1 + $0x38] sm:$0xff]  ;;  %v30_v15 = vld [vmem:[%s364_s0 + $0x8] sm:$0xff]  ;;  %s266_s1 = smov [#allocation3]  }
   0x8   :  { %v233_v14 = vpack.c.bf16 %v38_v13, %v37_v12  ;;  %s164_s6 = sshll.u32 %s266_s1, 4  ;;  %s165_s6 = int_to_ptr.vmem [resolvable:$true] %s164_s6 }
   0x9   :  { %s242_s0 = scalar_lea.vmem %s165_s6, 256  ;;  %p247_p1 = scmp.lt.s32.totalorder %s165_s6, %s165_s6 }
   0xa   :  { %p243_p0 = scmp.ne.s32.totalorder %s165_s6, %s242_s0  ;;  %p248_p2 = scmp.lt.s32.totalorder %s242_s0, %s242_s0 }
   0xb   :  { %v40_v16 = vld [vmem:[#allocation2 + $0x8] sm:$0xff]  ;;  %v39_v17 = vld [vmem:[#allocation2] sm:$0xff] }
   0xc   :  { %p249_p3 = por %p248_p2, %p247_p1 }
   0xd   :  { %226 = vmatpush3.bf16.xpose.msk.msra.mxu0 %vm300_vm1, %v221_v6 }
   0xe   :  { %229 = vmatprep.subr.msk.bf16.mxu0 %vm300_vm1, %v227_v11  ;;  %p250_p4 = pnand %p249_p3, %p243_p0 }
  0x15   :  { %232 = vmatpush3.bf16.xpose.msk.msra.mxu0 %vm300_vm1, %v227_v11 }
  0x16   :  { %235 = vmatprep.subr.msk.bf16.mxu0 %vm300_vm1, %v233_v14 }
  0x1d   :  { %238 = vmatpush3.bf16.xpose.msk.msra.mxu0 %vm300_vm1, %v233_v14 }
  0x24   :  { %213 = vmatmul.mubr.msk.f32.vlgmr.msra.gmra.mrb[0].mxu0 %vm41_vm0, %v30_v15 }
  0xf7   :  { %v214_v18 = vpop.f32.mrb[0].mxu0 }
  0xf8   :  { %v148_v19 = vadd.f32 %v214_v18, %v40_v16  ;;  %v138_v20 = vpop.f32.mrb[1].mxu0 }
  0xf9   :  { %v147_v21 = vadd.f32 %v138_v20, %v39_v17 }
  0xfa   :  { %151 = vst.msk [vmem:[#allocation2 + $0x8] sm:$0xff] %vm26_vm2, %v148_v19 }
  0xfb   :  { %150 = vst.msk [vmem:[#allocation2] sm:$0xff] %vm26_vm2, %v147_v21 }
 0x101   :  { %v156_v22 = vld [vmem:[#allocation2 + $0x8] sm:$0xff] }
 0x102   :  { %v155_v23 = vld [vmem:[#allocation2] sm:$0xff]  ;;  %158 = vst.msk [vmem:[#allocation3 + $0x8] sm:$0xff] %vm26_vm2, %v156_v22 }
 0x103   :  { %157 = vst.msk [vmem:[#allocation3] sm:$0xff] %vm26_vm2, %v155_v23 }
 0x104   :  { %253 = shalt.err (!%p250_p4)
}
 0x105   :  { %s254_s9 = scalar_lea.hbm %s367_s3, 256 }
 0x106   :  { %p255_p5 = scmp.ne.s32.totalorder %s367_s3, %s254_s9  ;;  %p258_p6 = scmp.lt.u32.totalorder %s254_s9, %s367_s3 }
 0x108   :  { %p260_p7 = pnand %p258_p6, %p255_p5 }
 0x10a   :  { %263 = shalt.err (!%p260_p7)
}
 0x10b   :  { %s267_s14 = smov 128   ;;  %s268_s15 = smov 8  }
 0x10c   :  { %170 = dma.vmem_to_hbm [thread:$0]  %s165_s6, 256, %s367_s3, [#allocation4], %s267_s14, %s267_s14, %s268_s15  }
 0x10d   :  { %264 = dma.done.wait [#allocation4], 256  }
 0x10e   :  { %265 = vsyncadd [#allocation4], 4294967040 }
 0x10f   :  { %174 = vsyncpa [#allocation4], 1 }

</bundles_post_ra>
